<compile_context>
chip_gen: v6e
topology: v6e:2x2x1
jax: 0.10.0
libtpu: 0.0.40
codegen_flags: <defaults>
</compile_context>

<pallas_src>
import functools

import jax
import jax.numpy as jnp
from jax.experimental import pallas as pl
from jax.experimental.pallas import tpu as pltpu

LN_EPS = 1e-5


def _round_up(x, m):
    return (x + m - 1) // m * m


def _ln_relu(y, gamma, beta):
    # PyTorch nn.LayerNorm semantics: biased variance over the last dim
    # (two-pass form for numerical safety), affine transform, then ReLU.
    mu = jnp.mean(y, axis=-1, keepdims=True)
    d = y - mu
    var = jnp.mean(d * d, axis=-1, keepdims=True)
    yn = d * jax.lax.rsqrt(var + LN_EPS)
    return jnp.maximum(yn * gamma + beta, 0.0)


def reward_mlp_kernel(x_ref, w_ref, p_ref, bo_ref, o_ref,
                      *, d_in_pad, hidden, h_rows):
    cdt = w_ref.dtype               # compute dtype (bf16 default, f32 option)

    x = x_ref[...]                  # (Bt, d_in_pad), already in compute dtype
    p = p_ref[...]                  # (8, H) f32: one load for all small params
    b0, b1, g1, be1 = p[0:1], p[1:2], p[2:3], p[3:4]
    b2, g2, be2 = p[4:5], p[5:6], p[6:7]
    wo_row = p[7:8]                 # (1, H) output head weights
    bo = bo_ref[0, 0]               # scalar output bias from SMEM

    # Stacked weight views -- static, sublane-aligned slices (free).
    w0 = w_ref[0:d_in_pad, :]                                    # (d_in_pad, H)
    w1 = w_ref[d_in_pad:d_in_pad + hidden, :]                    # (H, H)
    w2 = w_ref[d_in_pad + h_rows:d_in_pad + h_rows + hidden, :]  # (H, H)

    # input_fc + ReLU: single fused K=d_in_pad MXU pass, f32 accumulation.
    h = jnp.dot(x, w0, preferred_element_type=jnp.float32) + b0
    h = jnp.maximum(h, 0.0)

    # hidden layer 1: fc -> LayerNorm -> ReLU   (f32 LN statistics)
    y = jnp.dot(h.astype(cdt), w1, preferred_element_type=jnp.float32) + b1
    h = _ln_relu(y, g1, be1)

    # hidden layer 2: fc -> LayerNorm -> ReLU
    y = jnp.dot(h.astype(cdt), w2, preferred_element_type=jnp.float32) + b2
    h = _ln_relu(y, g2, be2)

    # output_fc (out_features == 1): contract over H with wo as the (1, H) lhs,
    # producing a lane-dense (1, Bt) row directly (no width-1 masked stores).
    out_row = jax.lax.dot_general(
        wo_row, h, (((1,), (1,)), ((), ())),
        preferred_element_type=jnp.float32) + bo
    o_ref[...] = out_row.astype(o_ref.dtype)


def reward_model_forward(z, a, z_next, params, *, block_b=None,
                         compute_dtype=jnp.bfloat16):
    B, d_z = z.shape
    d_a = a.shape[-1]
    d_in = 2 * d_z + d_a
    H = params["w0"].shape[1]
    wdt = jnp.dtype(compute_dtype)

    d_in_pad = _round_up(d_in, 8)
    h_rows = _round_up(H, 8)

    # Fused concat (done once in the wrapper; a handful of bytes per row),
    # zero-padded to a sublane-aligned width, cast ONCE to the compute dtype.
    x = jnp.concatenate([z, a, z_next], axis=-1).astype(wdt)
    if d_in_pad != d_in:
        x = jnp.pad(x, ((0, 0), (0, d_in_pad - d_in)))

    # Stack all weight matrices (rows padded to multiples of 8) into one
    # grid-constant array -> one DMA and one padded VMEM tile.
    def pad_rows(w, rows):
        return jnp.pad(w, ((0, rows - w.shape[0]), (0, 0)))

    w_all = jnp.concatenate([
        pad_rows(params["w0"], d_in_pad),   # zero rows pair with x's zero cols
        pad_rows(params["w1"], h_rows),
        pad_rows(params["w2"], h_rows),
    ], axis=0).astype(wdt)
    R = w_all.shape[0]

    # All (1, H)-shaped params + output head packed into exactly one (8, H)
    # sublane tile; the scalar output bias goes to SMEM.
    packed = jnp.concatenate([
        params["b0"], params["b1"], params["g1"], params["be1"],
        params["b2"], params["g2"], params["be2"],
        params["wo"].reshape(1, H),
    ], axis=0).astype(jnp.float32)
    bo = params["bo"].reshape(1, 1).astype(jnp.float32)

    lane = lambda n: _round_up(max(int(n), 1), 128)
    sub = lambda n: _round_up(max(int(n), 1), 8)

    # ---- batch tile size: VMEM-budgeted and lane-padding aware ----
    if block_b is None:
        if B <= 1024:
            block_b = B                        # single tile; whole batch resident
        else:
            const_bytes = (sub(R) * lane(H) * wdt.itemsize   # weights (1-buffered)
                           + 8 * lane(H) * 4)                 # packed params
            per_row = (2 * lane(d_in_pad) * wdt.itemsize      # 2-buffered input
                       + 6 * lane(H) * 4                      # f32 intermediates
                       + 2 * 4)                               # lane-dense out row
            budget = 40 * 1024 * 1024           # headroom under v7x's 64 MiB
            max_rows = max(256, min(2048,
                                    (budget - const_bytes) // per_row // 256 * 256))
            # Grid length >= 2 and even so both v7x TensorCores get work.
            n_tiles = max(2, pl.cdiv(B, max_rows))
            n_tiles += n_tiles % 2
            block_b = _round_up(pl.cdiv(B, n_tiles), 256)
    grid = (pl.cdiv(B, block_b),)

    # ---- explicit VMEM budget (lane-padded; constants single-buffered) ----
    w_bytes = sub(R) * lane(H) * wdt.itemsize
    p_bytes = 8 * lane(H) * 4
    in_bytes = 2 * sub(block_b) * lane(d_in_pad) * wdt.itemsize
    out_bytes = 2 * 8 * lane(block_b) * 4
    act_bytes = 6 * sub(block_b) * lane(H) * 4
    vmem_limit = int(min(56 * 1024 * 1024,
                         max(16 * 1024 * 1024,
                             1.5 * (w_bytes + p_bytes + in_bytes
                                    + out_bytes + act_bytes))))
    # TODO(synk): for very wide reward models (H >= ~4096) add a hidden-dim grid
    # axis that K/N-tiles w1/w2 instead of keeping them fully VMEM-resident.

    def row_map(i):            # batch-tiled operands
        return (i, 0)

    def const_map(i):          # grid-constant operands
        return (0, 0)

    def const_spec(shape):
        # Block index never changes -> single-buffer to avoid wasted VMEM.
        return pl.BlockSpec(shape, const_map, pipeline_mode=pl.Buffered(1))

    in_specs = [
        pl.BlockSpec((block_b, d_in_pad), row_map),          # x = [z|a|z_next]
        const_spec((R, H)),                                  # stacked W0/W1/W2
        const_spec((8, H)),                                  # packed small params
        pl.BlockSpec(memory_space=pltpu.MemorySpace.SMEM),   # scalar output bias
    ]
    out_specs = pl.BlockSpec((1, block_b), lambda i: (0, i))  # lane-dense rewards
    out_shape = jax.ShapeDtypeStruct((1, B), jnp.float32)

    fn = pl.pallas_call(
        functools.partial(reward_mlp_kernel,
                          d_in_pad=d_in_pad, hidden=H, h_rows=h_rows),
        grid=grid,
        in_specs=in_specs,
        out_specs=out_specs,
        out_shape=out_shape,
        compiler_params=pltpu.CompilerParams(
            dimension_semantics=("parallel",),
            vmem_limit_bytes=vmem_limit),
    )
    out = fn(x, w_all, packed, bo)
    return out.reshape(B, 1)


def reference_forward(z, a, z_next, p):
    x = jnp.concatenate([z, a, z_next], axis=-1).astype(jnp.float32)
    h = jnp.maximum(x @ p["w0"] + p["b0"], 0.0)
    for w, b, g, be in ((p["w1"], p["b1"], p["g1"], p["be1"]),
                        (p["w2"], p["b2"], p["g2"], p["be2"])):
        y = h @ w + b
        mu = jnp.mean(y, axis=-1, keepdims=True)
        var = jnp.mean((y - mu) ** 2, axis=-1, keepdims=True)
        h = jnp.maximum((y - mu) / jnp.sqrt(var + LN_EPS) * g + be, 0.0)
    return h @ p["wo"] + p["bo"]


def init_params(key, d_in, hidden):
    # Deterministic synthetic init (shapes match MLPModel(d_in, hidden, 1, 2)).
    ks = jax.random.split(key, 8)
    scale = lambda fan_in: 1.0 / jnp.sqrt(jnp.float32(fan_in))
    return {
        "w0": jax.random.normal(ks[0], (d_in, hidden), jnp.float32) * scale(d_in),
        "b0": jax.random.normal(ks[1], (1, hidden), jnp.float32) * 0.1,
        "w1": jax.random.normal(ks[2], (hidden, hidden), jnp.float32) * scale(hidden),
        "b1": jnp.zeros((1, hidden), jnp.float32),
        "g1": jnp.ones((1, hidden), jnp.float32),
        "be1": jnp.zeros((1, hidden), jnp.float32),
        "w2": jax.random.normal(ks[3], (hidden, hidden), jnp.float32) * scale(hidden),
        "b2": jnp.zeros((1, hidden), jnp.float32),
        "g2": jnp.ones((1, hidden), jnp.float32),
        "be2": jnp.zeros((1, hidden), jnp.float32),
        "wo": jax.random.normal(ks[4], (hidden, 1), jnp.float32) * scale(hidden),
        "bo": jnp.zeros((1, 1), jnp.float32),
    }


if __name__ == "__main__":
    # Small shapes consistent with RewardModel(latent_dim, action_shape, hidden_dim).
    batch, latent_dim, action_shape, hidden_dim = 8, 16, 4, 32
    d_in = latent_dim * 2 + action_shape

    key = jax.random.PRNGKey(0)
    kz, ka, kn, kp = jax.random.split(key, 4)
    z = jax.random.normal(kz, (batch, latent_dim), jnp.float32)
    a = jax.random.normal(ka, (batch, action_shape), jnp.float32)
    z_next = jax.random.normal(kn, (batch, latent_dim), jnp.float32)

    params = init_params(kp, d_in, hidden_dim)
    ref = reference_forward(z, a, z_next, params)

    # f32 path: tight check against the PyTorch-semantics reference.
    out_f32 = reward_model_forward(z, a, z_next, params, compute_dtype=jnp.float32)
    out_f32 = jax.block_until_ready(out_f32)
    assert out_f32.shape == (batch, 1)
    assert jnp.allclose(out_f32, ref, atol=1e-4, rtol=1e-4), "f32 kernel mismatch vs reference"

    # Default path: bf16 weights/activations, f32 MXU accumulation / LN stats.
    out = reward_model_forward(z, a, z_next, params)
    out = jax.block_until_ready(out)
    assert out.shape == (batch, 1)
    assert jnp.allclose(out, ref, atol=2e-1, rtol=2e-1), "bf16 kernel mismatch vs reference"

    print("KERNEL_OK")
</pallas_src>

<mosaic_0001>
module attributes {stable_mosaic.version = 11 : i64} {
  func.func @reward_mlp_kernel(%arg0: i32, %arg1: memref<8x40xf32, #tpu.memory_space<vmem>>, %arg2: memref<104x32xf32, #tpu.memory_space<vmem>>, %arg3: memref<8x32xf32, #tpu.memory_space<vmem>>, %arg4: memref<1x1xf32, #tpu.memory_space<smem>>, %arg5: memref<1x8xf32, #tpu.memory_space<vmem>>) attributes {dimension_semantics = [#tpu.dimension_semantics<parallel>], iteration_bounds = array<i64: 1>, scalar_prefetch = 0 : i64, scratch_operands = 0 : i64, tpu.core_type = #tpu.core_type<tc>, window_params = [{transform_indices = @transform_0, window_bounds = array<i64: 8, 40>}, {pipeline_mode = #tpu.pipeline_mode<synchronous>, transform_indices = @transform_1, window_bounds = array<i64: 104, 32>}, {pipeline_mode = #tpu.pipeline_mode<synchronous>, transform_indices = @transform_2, window_bounds = array<i64: 8, 32>}, {transform_indices = @transform_3, window_bounds = array<i64: 1, 1>}, {transform_indices = @transform_4, window_bounds = array<i64: 1, 8>}]} {
    %c0 = arith.constant 0 : index
    %c0_0 = arith.constant 0 : index
    %0 = vector.load %arg1[%c0, %c0_0] : memref<8x40xf32, #tpu.memory_space<vmem>>, vector<8x40xf32>
    %c0_1 = arith.constant 0 : index
    %c0_2 = arith.constant 0 : index
    %1 = vector.load %arg3[%c0_1, %c0_2] : memref<8x32xf32, #tpu.memory_space<vmem>>, vector<8x32xf32>
    %2 = vector.extract_strided_slice %1 {offsets = [0, 0], sizes = [1, 32], strides = [1, 1]} : vector<8x32xf32> to vector<1x32xf32>
    %3 = vector.extract_strided_slice %1 {offsets = [1, 0], sizes = [1, 32], strides = [1, 1]} : vector<8x32xf32> to vector<1x32xf32>
    %4 = vector.extract_strided_slice %1 {offsets = [2, 0], sizes = [1, 32], strides = [1, 1]} : vector<8x32xf32> to vector<1x32xf32>
    %5 = vector.extract_strided_slice %1 {offsets = [3, 0], sizes = [1, 32], strides = [1, 1]} : vector<8x32xf32> to vector<1x32xf32>
    %6 = vector.extract_strided_slice %1 {offsets = [4, 0], sizes = [1, 32], strides = [1, 1]} : vector<8x32xf32> to vector<1x32xf32>
    %7 = vector.extract_strided_slice %1 {offsets = [5, 0], sizes = [1, 32], strides = [1, 1]} : vector<8x32xf32> to vector<1x32xf32>
    %8 = vector.extract_strided_slice %1 {offsets = [6, 0], sizes = [1, 32], strides = [1, 1]} : vector<8x32xf32> to vector<1x32xf32>
    %9 = vector.extract_strided_slice %1 {offsets = [7, 0], sizes = [1, 32], strides = [1, 1]} : vector<8x32xf32> to vector<1x32xf32>
    %c0_3 = arith.constant 0 : index
    %c0_4 = arith.constant 0 : index
    %10 = memref.load %arg4[%c0_3, %c0_4] : memref<1x1xf32, #tpu.memory_space<smem>>
    %c0_5 = arith.constant 0 : index
    %c0_6 = arith.constant 0 : index
    %11 = vector.load %arg2[%c0_5, %c0_6] : memref<104x32xf32, #tpu.memory_space<vmem>>, vector<40x32xf32>
    %c40 = arith.constant 40 : index
    %c0_7 = arith.constant 0 : index
    %12 = vector.load %arg2[%c40, %c0_7] : memref<104x32xf32, #tpu.memory_space<vmem>>, vector<32x32xf32>
    %c72 = arith.constant 72 : index
    %c0_8 = arith.constant 0 : index
    %13 = vector.load %arg2[%c72, %c0_8] : memref<104x32xf32, #tpu.memory_space<vmem>>, vector<32x32xf32>
    %cst = arith.constant dense<0.000000e+00> : vector<8x32xf32>
    %14 = tpu.matmul %0, %11, %cst {dimension_numbers = #tpu.dot_dimension_numbers<[1], [0], [0], [1], [0, 0, 1, 1], [], []>} : vector<8x40xf32>, vector<40x32xf32>, vector<8x32xf32> -> vector<8x32xf32>
    %15 = vector.broadcast %2 : vector<1x32xf32> to vector<8x32xf32>
    %16 = arith.addf %14, %15 : vector<8x32xf32>
    %cst_9 = arith.constant 0.000000e+00 : f32
    %17 = vector.broadcast %cst_9 : f32 to vector<8x32xf32>
    %18 = arith.maximumf %16, %17 : vector<8x32xf32>
    %cst_10 = arith.constant dense<0.000000e+00> : vector<8x32xf32>
    %19 = tpu.matmul %18, %12, %cst_10 {dimension_numbers = #tpu.dot_dimension_numbers<[1], [0], [0], [1], [0, 0, 1, 1], [], []>} : vector<8x32xf32>, vector<32x32xf32>, vector<8x32xf32> -> vector<8x32xf32>
    %20 = vector.broadcast %3 : vector<1x32xf32> to vector<8x32xf32>
    %21 = arith.addf %19, %20 : vector<8x32xf32>
    %cst_11 = arith.constant dense<0.000000e+00> : vector<8xf32>
    %22 = vector.multi_reduction <add>, %21, %cst_11 [1] : vector<8x32xf32> to vector<8xf32>
    %23 = vector.shape_cast %22 : vector<8xf32> to vector<8x1xf32>
    %cst_12 = arith.constant 3.200000e+01 : f32
    %24 = vector.broadcast %cst_12 : f32 to vector<8x1xf32>
    %25 = arith.divf %23, %24 : vector<8x1xf32>
    %26 = vector.broadcast %25 : vector<8x1xf32> to vector<8x32xf32>
    %27 = arith.subf %21, %26 : vector<8x32xf32>
    %28 = arith.mulf %27, %27 : vector<8x32xf32>
    %cst_13 = arith.constant dense<0.000000e+00> : vector<8xf32>
    %29 = vector.multi_reduction <add>, %28, %cst_13 [1] : vector<8x32xf32> to vector<8xf32>
    %30 = vector.shape_cast %29 : vector<8xf32> to vector<8x1xf32>
    %cst_14 = arith.constant 3.200000e+01 : f32
    %31 = vector.broadcast %cst_14 : f32 to vector<8x1xf32>
    %32 = arith.divf %30, %31 : vector<8x1xf32>
    %cst_15 = arith.constant 9.99999974E-6 : f32
    %33 = vector.broadcast %cst_15 : f32 to vector<8x1xf32>
    %34 = arith.addf %32, %33 : vector<8x1xf32>
    %35 = math.rsqrt %34 : vector<8x1xf32>
    %36 = vector.broadcast %35 : vector<8x1xf32> to vector<8x32xf32>
    %37 = arith.mulf %27, %36 : vector<8x32xf32>
    %38 = vector.broadcast %4 : vector<1x32xf32> to vector<8x32xf32>
    %39 = arith.mulf %37, %38 : vector<8x32xf32>
    %40 = vector.broadcast %5 : vector<1x32xf32> to vector<8x32xf32>
    %41 = arith.addf %39, %40 : vector<8x32xf32>
    %cst_16 = arith.constant 0.000000e+00 : f32
    %42 = vector.broadcast %cst_16 : f32 to vector<8x32xf32>
    %43 = arith.maximumf %41, %42 : vector<8x32xf32>
    %cst_17 = arith.constant dense<0.000000e+00> : vector<8x32xf32>
    %44 = tpu.matmul %43, %13, %cst_17 {dimension_numbers = #tpu.dot_dimension_numbers<[1], [0], [0], [1], [0, 0, 1, 1], [], []>} : vector<8x32xf32>, vector<32x32xf32>, vector<8x32xf32> -> vector<8x32xf32>
    %45 = vector.broadcast %6 : vector<1x32xf32> to vector<8x32xf32>
    %46 = arith.addf %44, %45 : vector<8x32xf32>
    %cst_18 = arith.constant dense<0.000000e+00> : vector<8xf32>
    %47 = vector.multi_reduction <add>, %46, %cst_18 [1] : vector<8x32xf32> to vector<8xf32>
    %48 = vector.shape_cast %47 : vector<8xf32> to vector<8x1xf32>
    %cst_19 = arith.constant 3.200000e+01 : f32
    %49 = vector.broadcast %cst_19 : f32 to vector<8x1xf32>
    %50 = arith.divf %48, %49 : vector<8x1xf32>
    %51 = vector.broadcast %50 : vector<8x1xf32> to vector<8x32xf32>
    %52 = arith.subf %46, %51 : vector<8x32xf32>
    %53 = arith.mulf %52, %52 : vector<8x32xf32>
    %cst_20 = arith.constant dense<0.000000e+00> : vector<8xf32>
    %54 = vector.multi_reduction <add>, %53, %cst_20 [1] : vector<8x32xf32> to vector<8xf32>
    %55 = vector.shape_cast %54 : vector<8xf32> to vector<8x1xf32>
    %cst_21 = arith.constant 3.200000e+01 : f32
    %56 = vector.broadcast %cst_21 : f32 to vector<8x1xf32>
    %57 = arith.divf %55, %56 : vector<8x1xf32>
    %cst_22 = arith.constant 9.99999974E-6 : f32
    %58 = vector.broadcast %cst_22 : f32 to vector<8x1xf32>
    %59 = arith.addf %57, %58 : vector<8x1xf32>
    %60 = math.rsqrt %59 : vector<8x1xf32>
    %61 = vector.broadcast %60 : vector<8x1xf32> to vector<8x32xf32>
    %62 = arith.mulf %52, %61 : vector<8x32xf32>
    %63 = vector.broadcast %7 : vector<1x32xf32> to vector<8x32xf32>
    %64 = arith.mulf %62, %63 : vector<8x32xf32>
    %65 = vector.broadcast %8 : vector<1x32xf32> to vector<8x32xf32>
    %66 = arith.addf %64, %65 : vector<8x32xf32>
    %cst_23 = arith.constant 0.000000e+00 : f32
    %67 = vector.broadcast %cst_23 : f32 to vector<8x32xf32>
    %68 = arith.maximumf %66, %67 : vector<8x32xf32>
    %cst_24 = arith.constant dense<0.000000e+00> : vector<1x8xf32>
    %69 = tpu.matmul %9, %68, %cst_24 {dimension_numbers = #tpu.dot_dimension_numbers<[1], [1], [0], [0], [0, 0, 1, 0], [], []>} : vector<1x32xf32>, vector<8x32xf32>, vector<1x8xf32> -> vector<1x8xf32>
    %70 = vector.broadcast %10 : f32 to vector<1x8xf32>
    %71 = arith.addf %69, %70 : vector<1x8xf32>
    %c0_25 = arith.constant 0 : index
    %c0_26 = arith.constant 0 : index
    %72 = vector.load %arg5[%c0_25, %c0_26] : memref<1x8xf32, #tpu.memory_space<vmem>>, vector<1x8xf32>
    tpu.vector_store %arg5[%c0_25, %c0_26], %71 {strides = array<i32>} : memref<1x8xf32, #tpu.memory_space<vmem>>, vector<1x8xf32>,
    return
  }
  func.func @transform_0(%arg0: i32) -> (i32, i32) {
    %c0_i32 = arith.constant 0 : i32
    %c0_i32_0 = arith.constant 0 : i32
    return %arg0, %c0_i32 : i32, i32
  }
  func.func @transform_1(%arg0: i32) -> (i32, i32) {
    %c0_i32 = arith.constant 0 : i32
    %c0_i32_0 = arith.constant 0 : i32
    %c0_i32_1 = arith.constant 0 : i32
    return %c0_i32, %c0_i32_0 : i32, i32
  }
  func.func @transform_2(%arg0: i32) -> (i32, i32) {
    %c0_i32 = arith.constant 0 : i32
    %c0_i32_0 = arith.constant 0 : i32
    %c0_i32_1 = arith.constant 0 : i32
    return %c0_i32, %c0_i32_0 : i32, i32
  }
  func.func @transform_3(%arg0: i32) -> (i32, i32) {
    %c0_i32 = arith.constant 0 : i32
    %c0_i32_0 = arith.constant 0 : i32
    %c0_i32_1 = arith.constant 0 : i32
    return %c0_i32, %c0_i32_0 : i32, i32
  }
  func.func @transform_4(%arg0: i32) -> (i32, i32) {
    %c0_i32 = arith.constant 0 : i32
    %c0_i32_0 = arith.constant 0 : i32
    return %c0_i32, %arg0 : i32, i32
  }
}

</mosaic_0001>

<bundles_post_ra>
// kernel: tpu_custom_call.1
= control target key start
LH: loop header
LB: loop body
LE: loop exit
PB: predicated region body
PF: predicated region fallthrough
CT: control target
= control target key end

     0   :  { %v504_v1 = vmov 0.0   ;;  %vm505_vm0 = vmmov 0   ;;  %s632_s0 = inlined_call_operand.vmem [shape: f32[8,40], index: 0, kind: input, shape index: {}]   ;;  %s633_s1 = inlined_call_operand.vmem [shape: f32[104,32], index: 1, kind: input, shape index: {}]   ;;  %s634_s2 = inlined_call_operand.vmem [shape: f32[8,32], index: 2, kind: input, shape index: {}]   ;;  %s635_s3 = inlined_call_operand.<no memory space> [shape: f32[1,1], index: 3, kind: input, shape index: {}]   ;;  %s636_s4 = inlined_call_operand.hbm [shape: f32[1,8], index: 4, kind: output, shape index: {}]  }
   0x1   :  { %v26_v0 = vld [vmem:[%s633_s1 + $0x20] sm:$0xff]  ;;  %435 = vmatprep.subr.mxu0 %v504_v1  ;;  %v25_v2 = vld [vmem:[%s633_s1 + $0x18] sm:$0xff]  ;;  %445 = vmatprep.mubr.msk.f32.mxu0 %vm505_vm0, %v504_v1 }
   0x2   :  { %436 = vmatpush3.msra.mxu0 %v26_v0  ;;  %448 = vmatprep.subr.mxu1 %v504_v1  ;;  %v30_v3 = vld [vmem:[%s633_s1 + $0x40] sm:$0xff] }
   0x3   :  { %10 = vsyncpa [#allocation4], 0  ;;  %437 = vmatprep.subr.mxu0 %v504_v1  ;;  %v24_v4 = vld [vmem:[%s633_s1 + $0x10] sm:$0xff]  ;;  %449 = vmatpush3.msra.mxu1 %v30_v3  ;;  %v23_v5 = vld [vmem:[%s633_s1 + $0x8] sm:$0xff]  ;;  %vm39_vm1 = vcmask 326656   ;;  %v35_v11 = vlaneseq  ;;  %vm118_vm2 = vcmask 261120  }
   0x4   :  { %438 = vmatpush3.msra.mxu0 %v25_v2  ;;  %450 = vmatprep.subr.mxu1 %v504_v1  ;;  %v22_v6 = vld [vmem:[%s633_s1] sm:$0xff]  ;;  %v29_v8 = vld [vmem:[%s633_s1 + $0x38] sm:$0xff]  ;;  %v28_v9 = vld [vmem:[%s633_s1 + $0x30] sm:$0xff]  ;;  %s506_s18 = smov [#allocation3]   ;;  %vm396_vm3 = vcmask 57344  }
   0x5   :  { %439 = vmatprep.subr.mxu0 %v504_v1  ;;  %456 = vmatprep.mubr.msk.f32.mxu1 %vm505_vm0, %v504_v1  ;;  %v19_v7 = vld [vmem:[%s632_s0] sm:$0xff]  ;;  %v27_v10 = vld [vmem:[%s633_s1 + $0x28] sm:$0xff]  ;;  %v579_v12 = vshrl.u32 %v35_v11, 7  ;;  %v33_v32 = vld [vmem:[%s633_s1 + $0x58] sm:$0xff]  ;;  %s404_s19 = sshll.u32 %s506_s18, 4  ;;  %s405_s19 = int_to_ptr.vmem [resolvable:$true] %s404_s19 }
   0x6   :  { %440 = vmatpush3.msra.mxu0 %v24_v4  ;;  %451 = vmatpush3.msra.mxu1 %v29_v8  ;;  %v585_v14 = vld [vmem:[%s634_s2] sm:$0xff]  ;;  %v32_v33 = vld [vmem:[%s633_s1 + $0x50] sm:$0xff]  ;;  %v31_v34 = vld [vmem:[%s633_s1 + $0x48] sm:$0xff]  ;;  %s482_s20 = scalar_lea.vmem %s405_s19, 16  ;;  %s486_s21 = scalar_lea.vmem %s405_s19, 32 }
   0x7   :  { %441 = vmatprep.subr.mxu0 %v504_v1  ;;  %452 = vmatprep.subr.mxu1 %v504_v1  ;;  %v37_v13 = vsub.s32 0, %v579_v12  ;;  %v116_v20 = vsub.s32 1, %v579_v12  ;;  %v34_v31 = vld [vmem:[%s633_s1 + $0x60] sm:$0xff]  ;;  %v208_v38 = vsub.s32 2, %v579_v12  ;;  %v213_v39 = vsub.s32 3, %v579_v12  ;;  %p483_p0 = scmp.ne.s32.totalorder %s405_s19, %s482_s20  ;;  %p487_p1 = scmp.lt.s32.totalorder %s405_s19, %s405_s19 }
   0x8   :  { %442 = vmatpush3.msra.mxu0 %v23_v5  ;;  %453 = vmatpush3.msra.mxu1 %v28_v9  ;;  %v219_v47 = vsub.s32 4, %v579_v12  ;;  %v309_v61 = vsub.s32 5, %v579_v12  ;;  %v314_v62 = vsub.s32 6, %v579_v12  ;;  %p488_p2 = scmp.lt.s32.totalorder %s486_s21, %s482_s20 }
   0x9   :  { %443 = vmatprep.subr.mxu0 %v504_v1  ;;  %454 = vmatprep.subr.mxu1 %v504_v1  ;;  %v38_v15 = vrot.slane %v585_v14, %v37_v13  ;;  %v117_v21 = vrot.slane %v585_v14, %v116_v20  ;;  %v209_v40 = vrot.slane %v585_v14, %v208_v38 }
   0xa   :  { %444 = vmatpush3.msra.mxu0 %v22_v6  ;;  %455 = vmatpush3.msra.mxu1 %v27_v10  ;;  %v214_v43 = vrot.slane %v585_v14, %v213_v39  ;;  %v220_v48 = vrot.slane %v585_v14, %v219_v47  ;;  %v310_v63 = vrot.slane %v585_v14, %v309_v61  ;;  %v320_v6 = vrot.slane %v585_v14, 7  ;;  %p489_p3 = por %p488_p2, %p487_p1 }
   0xb   :  { %446 = vmatmul.mubr.msk.f32.vlgmr.msra.gmra.mxu0 %vm39_vm1, %v19_v7  ;;  %470 = vmatprep.subr.mxu0 %v504_v1  ;;  %v315_v2 = vrot.slane %v585_v14, %v314_v62  ;;  %v318_v7 = vstv %s635_s3 }
   0xc   :  { %472 = vmatprep.mubr.msk.f32.mxu0 %vm505_vm0, %v504_v1  ;;  %459 = vmatprep.subr.mxu1 %v504_v1  ;;  %p490_p4 = pnand %p489_p3, %p483_p0 }
  0xcb   :  { %v109_v16 = vpop.f32.mrf.mxu0 }
  0xcc   :  { %v110_v17 = vadd.f32 %v109_v16, %v38_v15 }
  0xcd   :  { %v447_v18 = vpop.f32.mrf.mxu0 }
  0xce   :  { %v113_v19 = vmax.f32 %v110_v17, 0.0 }
  0xd0   :  { %457 = vmatmul.mubr.msk.f32.vlgmr.msra.gmra.mxu1 %vm118_vm2, %v113_v19 }
  0xd1   :  { %467 = vmatprep.mubr.msk.f32.mxu1 %vm505_vm0, %v504_v1  ;;  %460 = vmatpush3.msra.mxu1 %v34_v31 }
  0xd2   :  { %461 = vmatprep.subr.mxu1 %v504_v1 }
  0xd3   :  { %462 = vmatpush3.msra.mxu1 %v33_v32 }
  0xd4   :  { %463 = vmatprep.subr.mxu1 %v504_v1 }
  0xd5   :  { %464 = vmatpush3.msra.mxu1 %v32_v33 }
  0xd6   :  { %465 = vmatprep.subr.mxu1 %v504_v1 }
  0xd7   :  { %466 = vmatpush3.msra.mxu1 %v31_v34 }
 0x190   :  { %v188_v22 = vpop.f32.mrf.mxu1 }
 0x191   :  { %v189_v23 = vadd.f32 %v188_v22, %v117_v21 }
 0x192   :  { %v458_v24 = vpop.f32.mrf.mxu1 }
 0x193   :  { %v192_v25 = vsel %vm118_vm2, %v189_v23, 0.0 }
 0x194   :  { %193 = vadd.xlane.f32.xlu0 %v192_v25 }
 0x21d   :  { %v194_v26 = vpop.xlane.xlu0 %193 }
 0x21e   :  { %v196_v27 = vmul.f32 0.03125, %v194_v26 }
 0x220   :  { %v197_v28 = vsub.f32 %v189_v23, %v196_v27 }
 0x222   :  { %v198_v29 = vmul.f32 %v197_v28, %v197_v28 }
 0x224   :  { %v199_v30 = vsel %vm118_vm2, %v198_v29, 0.0 }
 0x225   :  { %200 = vadd.xlane.f32.xlu0 %v199_v30 }
 0x2ae   :  { %v201_v35 = vpop.xlane.xlu0 %200 }
 0x2af   :  { %v202_v36 = vmul.f32 0.03125, %v201_v35 }
 0x2b1   :  { %v203_v37 = vadd.f32 1e-05, %v202_v36 }
 0x2b3   :  { %478 = vrsqrt.f32 %v203_v37 }
 0x2c0   :  { %v479_v41 = vpop.eup %478 }
 0x2c1   :  { %v205_v42 = vmul.f32 %v479_v41, %v197_v28 }
 0x2c3   :  { %v210_v44 = vmul.f32 %v209_v40, %v205_v42 }
 0x2c5   :  { %v215_v45 = vadd.f32 %v214_v43, %v210_v44 }
 0x2c7   :  { %v216_v46 = vmax.f32 %v215_v45, 0.0 }
 0x2c9   :  { %468 = vmatmul.mubr.msk.f32.vlgmr.msra.gmra.mxu1 %vm118_vm2, %v216_v46 }
 0x389   :  { %v290_v49 = vpop.f32.mrf.mxu1 }
 0x38a   :  { %v291_v50 = vadd.f32 %v290_v49, %v220_v48 }
 0x38b   :  { %v469_v51 = vpop.f32.mrf.mxu1 }
 0x38c   :  { %v294_v52 = vsel %vm118_vm2, %v291_v50, 0.0 }
 0x38d   :  { %295 = vadd.xlane.f32.xlu1 %v294_v52 }
 0x416   :  { %v296_v53 = vpop.xlane.xlu1 %295 }
 0x417   :  { %v297_v54 = vmul.f32 0.03125, %v296_v53 }
 0x419   :  { %v298_v55 = vsub.f32 %v291_v50, %v297_v54 }
 0x41b   :  { %v299_v56 = vmul.f32 %v298_v55, %v298_v55 }
 0x41d   :  { %v300_v57 = vsel %vm118_vm2, %v299_v56, 0.0 }
 0x41e   :  { %301 = vadd.xlane.f32.xlu1 %v300_v57 }
 0x4a7   :  { %v302_v58 = vpop.xlane.xlu1 %301 }
 0x4a8   :  { %v303_v59 = vmul.f32 0.03125, %v302_v58 }
 0x4aa   :  { %v304_v60 = vadd.f32 1e-05, %v303_v59 }
 0x4ac   :  { %480 = vrsqrt.f32 %v304_v60 }
 0x4b9   :  { %v481_v0 = vpop.eup %480 }
 0x4ba   :  { %v306_v1 = vmul.f32 %v481_v0, %v298_v55 }
 0x4bc   :  { %v311_v3 = vmul.f32 %v310_v63, %v306_v1 }
 0x4be   :  { %v316_v4 = vadd.f32 %v315_v2, %v311_v3 }
 0x4c0   :  { %v317_v5 = vmax.f32 %v316_v4, 0.0 }
 0x4c2   :  { %471 = vmatpush3.xpose.msk.msra.mxu0 %vm118_vm2, %v317_v5 }
 0x4c5   :  { %473 = vmatmul.mubr.msk.f32.vlgmr.msra.gmra.mxu0 %vm118_vm2, %v320_v6 }
 0x585   :  { %v392_v8 = vpop.f32.mrf.mxu0 }
 0x586   :  { %v393_v9 = vadd.f32 %v392_v8, %v318_v7 }
 0x587   :  { %v474_v10 = vpop.f32.mrf.mxu0 }
 0x588   :  { %397 = vst.msk [vmem:[#allocation3] sm:$0x1] %vm396_vm3, %v393_v9 }
 0x589   :  { %493 = shalt.err (!%p490_p4)
}
 0x58a   :  { %407 = dma.vmem_to_hbm [thread:$0]  %s405_s19, 16, %s636_s4, [#allocation4]  }
 0x58b   :  { %502 = dma.done.wait [#allocation4], 16  }
 0x58c   :  { %503 = vsyncadd [#allocation4], 4294967280 }
 0x58d   :  { %411 = vsyncpa [#allocation4], 1 }

</bundles_post_ra>
